<compile_context>
chip_gen: v5e
topology: v5e:2x2
jax: 0.10.0
libtpu: 0.0.40
codegen_flags: <defaults>
</compile_context>

<pallas_src>
import functools
import math

import jax
import jax.numpy as jnp
from jax.experimental import pallas as pl
from jax.experimental.pallas import tpu as pltpu

_LANE = 128            # f32 lane width
_MAX_FTILE = 512       # frequency tile cap (mem-bound: big tiles amortize step cost)
_MAX_UNROLL = 256      # cap on bt*cin static unroll inside the kernel
_BLOCK_BUDGET = 6 << 20  # single-copy per-step byte budget for x+out blocks


def _round_up(x, m):
    return ((x + m - 1) // m) * m


# ----------------------------------------------------------------------------
# Pallas kernel: one grid step == one (batch-block, frequency-tile).
#   xs_ref : (2, bt*cin,  FT) real/imag activations, frequency in lanes
#   ws_ref : (2, cin*cout, FT) real/imag weights
#   bs_ref : (2, cout,     FT) real/imag bias
#   out_ref: (2, bt*cout,  FT) real/imag outputs
# Complex contraction over Cin on the VPU:
#   (Xr + iXi)(Wr + iWi) = (Xr*Wr - Xi*Wi) + i(Xr*Wi + Xi*Wr)
# ----------------------------------------------------------------------------
def _banded_freq_vpu_kernel(xs_ref, ws_ref, bs_ref, out_ref, *, bt, cin, cout):
    br = bs_ref[0]                      # (cout, FT) — loaded once, reused for all b
    bi = bs_ref[1]
    for b in range(bt):                 # static unroll, bt kept small by wrapper
        acc_r = br                      # bias-initialized accumulators
        acc_i = bi
        base = b * cin
        for i in range(cin):            # static unroll, cin is small
            xr = xs_ref[0, pl.ds(base + i, 1), :]       # (1, FT), broadcasts over cout
            xi = xs_ref[1, pl.ds(base + i, 1), :]
            wr = ws_ref[0, pl.ds(i * cout, cout), :]    # (cout, FT)
            wi = ws_ref[1, pl.ds(i * cout, cout), :]
            acc_r = acc_r + xr * wr - xi * wi
            acc_i = acc_i + xr * wi + xi * wr
        out_ref[0, pl.ds(b * cout, cout), :] = acc_r
        out_ref[1, pl.ds(b * cout, cout), :] = acc_i


def _choose_batch_tile(B, cin, cout, ftile):
    """Largest divisor of B that keeps the per-step block small, the unroll
    bounded, and (unless full-B) the sublane dims divisible by 8."""
    per_b = 8 * (cin + cout) * ftile          # f32 bytes (real+imag) of x+out per batch
    cap = max(1, _BLOCK_BUDGET // per_b)
    cap = min(cap, max(1, _MAX_UNROLL // max(1, cin)))
    best = B                                   # full batch is always a legal block
    for bt in range(min(B, cap), 0, -1):
        if B % bt:
            continue
        if bt == B or ((bt * cin) % 8 == 0 and (bt * cout) % 8 == 0):
            best = bt
            break
    return best


def banded_complex_freq_lane(xs, ws, bs, B, cin, cout, *, ftile):
    """Per-frequency complex matmul + bias, frequency-in-lanes layout.

    xs : (2, B*cin, Fp)    real/imag of the rfft band (Fp multiple of ftile)
    ws : (2, cin*cout, Fp) real/imag of the weights (frequency-last)
    bs : (2, cout, Fp)     real/imag of the bias
    returns (2, B*cout, Fp) float32
    """
    fp = xs.shape[-1]
    assert fp % ftile == 0
    n_f = fp // ftile
    bt = _choose_batch_tile(B, cin, cout, ftile)
    n_b = B // bt

    kernel = functools.partial(_banded_freq_vpu_kernel, bt=bt, cin=cin, cout=cout)

    spec_x = pl.BlockSpec((2, bt * cin, ftile), lambda b, f: (0, b, f))
    spec_w = pl.BlockSpec((2, cin * cout, ftile), lambda b, f: (0, 0, f))
    spec_b = pl.BlockSpec((2, cout, ftile), lambda b, f: (0, 0, f))
    spec_o = pl.BlockSpec((2, bt * cout, ftile), lambda b, f: (0, b, f))

    # f32 bytes in one grid step (real+imag of x, w, bias, out); double-buffered
    # by the pipeline, so reserve 4x plus headroom, clamped to a safe range.
    blk_bytes = 8 * ftile * (bt * cin + cin * cout + cout + bt * cout)
    vmem_limit = int(min(48 << 20, max(32 << 20, 4 * blk_bytes + (8 << 20))))

    return pl.pallas_call(
        kernel,
        out_shape=jax.ShapeDtypeStruct((2, B * cout, fp), jnp.float32),
        grid_spec=pltpu.PrefetchScalarGridSpec(
            num_scalar_prefetch=0,
            grid=(n_b, n_f),
            in_specs=[spec_x, spec_w, spec_b],
            out_specs=spec_o,
        ),
        compiler_params=pltpu.CompilerParams(
            dimension_semantics=("parallel", "parallel"),
            vmem_limit_bytes=vmem_limit),
    )(xs, ws, bs)


# ----------------------------------------------------------------------------
# Full forward pass (FFT glue in plain JAX, band math in Pallas).
# ----------------------------------------------------------------------------
def banded_fourier_forward(x, weight_r, weight_i, bias_r, bias_i, start, end):
    B, T, cin = x.shape
    cout = weight_r.shape[-1]
    total_freqs = T // 2 + 1
    F = end - start

    # rfft with frequency on the last (lane) axis: (B, cin, total_freqs).
    xf = jnp.fft.rfft(jnp.swapaxes(x, 1, 2), axis=-1)
    band = xf[..., start:end]                                 # (B, cin, F) complex

    # Frequency tile: one lane-dense tile when the band is small, else 512.
    f128 = _round_up(F, _LANE)
    if f128 <= _MAX_FTILE:
        ftile = f128
        fp = f128
    else:
        ftile = _MAX_FTILE
        fp = _round_up(F, _MAX_FTILE)
    pad = fp - F

    # Stacked real/imag, frequency-last, sublane-dense (B*cin rows). All of the
    # split/pad/reshape fuses into a single HBM pass under jit.
    xs = jnp.stack([jnp.real(band), jnp.imag(band)]).astype(jnp.float32)   # (2,B,cin,F)
    xs = jnp.pad(xs, ((0, 0), (0, 0), (0, 0), (0, pad))).reshape(2, B * cin, fp)

    ws = jnp.stack([weight_r, weight_i]).astype(jnp.float32)               # (2,F,cin,cout)
    ws = jnp.transpose(ws, (0, 2, 3, 1))                                   # (2,cin,cout,F)
    ws = jnp.pad(ws, ((0, 0), (0, 0), (0, 0), (0, pad))).reshape(2, cin * cout, fp)

    bs = jnp.stack([bias_r, bias_i]).astype(jnp.float32)                   # (2,F,cout)
    bs = jnp.transpose(bs, (0, 2, 1))                                      # (2,cout,F)
    bs = jnp.pad(bs, ((0, 0), (0, 0), (0, pad)))                           # (2,cout,fp)

    out = banded_complex_freq_lane(xs, ws, bs, B, cin, cout, ftile=ftile)  # (2,B*cout,fp)
    out = out.reshape(2, B, cout, fp)

    # Fused complex assembly + zero-extension to the full spectrum
    # (single pad pass — replaces the old zeros + scatter).
    band_c = jax.lax.complex(out[0, ..., :F], out[1, ..., :F])             # (B,cout,F)
    out_fft = jnp.pad(band_c, ((0, 0), (0, 0), (start, total_freqs - end)))
    y = jnp.fft.irfft(out_fft, n=T, axis=-1)                               # (B,cout,T)
    return jnp.swapaxes(y, 1, 2)                                           # (B,T,cout)


# Pure-JAX reference (mirrors the PyTorch module exactly).
def banded_fourier_forward_ref(x, weight_c, bias_c, start, end):
    B, T, _ = x.shape
    Cout = weight_c.shape[-1]
    total_freqs = T // 2 + 1
    xf = jnp.fft.rfft(x, axis=1)
    band = jnp.einsum('bti,tio->bto', xf[:, start:end, :], weight_c) + bias_c
    out_fft = jnp.zeros((B, total_freqs, Cout), dtype=jnp.complex64)
    out_fft = out_fft.at[:, start:end, :].set(band.astype(jnp.complex64))
    return jnp.fft.irfft(out_fft, n=T, axis=1)


if __name__ == "__main__":
    # Module hyperparameters (small, consistent with the PyTorch __init__).
    in_channels, out_channels = 4, 8
    band, num_bands = 1, 2
    length = 16                       # sequence length T (must match input T)
    batch = 2

    total_freqs = length // 2 + 1                                   # 9
    num_freqs = total_freqs // num_bands + (
        total_freqs % num_bands if band == num_bands - 1 else 0)    # 5
    start = band * (total_freqs // num_bands)                       # 4
    end = start + num_freqs                                         # 9

    # Deterministic parameter init (shapes from the module; kaiming-style bounds).
    key = jax.random.PRNGKey(0)
    k_wr, k_wi, k_br, k_bi, k_x = jax.random.split(key, 5)
    fan_in = in_channels * out_channels
    w_bound = math.sqrt(1.0 / fan_in)
    b_bound = 1.0 / math.sqrt(fan_in)

    weight_r = jax.random.uniform(k_wr, (num_freqs, in_channels, out_channels),
                                  jnp.float32, -w_bound, w_bound)
    weight_i = jax.random.uniform(k_wi, (num_freqs, in_channels, out_channels),
                                  jnp.float32, -w_bound, w_bound)
    bias_r = jax.random.uniform(k_br, (num_freqs, out_channels),
                                jnp.float32, -b_bound, b_bound)
    bias_i = jax.random.uniform(k_bi, (num_freqs, out_channels),
                                jnp.float32, -b_bound, b_bound)

    x = jax.random.normal(k_x, (batch, length, in_channels), jnp.float32)

    out = banded_fourier_forward(x, weight_r, weight_i, bias_r, bias_i,
                                 start, end)
    out = jax.block_until_ready(out)

    # Verify against the pure-JAX complex reference.
    weight_c = (weight_r + 1j * weight_i).astype(jnp.complex64)
    bias_c = (bias_r + 1j * bias_i).astype(jnp.complex64)
    ref = banded_fourier_forward_ref(x, weight_c, bias_c, start, end)
    ref = jax.block_until_ready(ref)

    assert out.shape == (batch, length, out_channels), out.shape
    assert jnp.allclose(out, ref, rtol=1e-4, atol=1e-5), (
        float(jnp.max(jnp.abs(out - ref))))

    print("KERNEL_OK")
</pallas_src>

<mosaic_0001>
module attributes {stable_mosaic.version = 11 : i64} {
  func.func @_banded_freq_vpu_kernel(%arg0: i32, %arg1: i32, %arg2: memref<2x8x128xf32, #tpu.memory_space<vmem>>, %arg3: memref<2x32x128xf32, #tpu.memory_space<vmem>>, %arg4: memref<2x8x128xf32, #tpu.memory_space<vmem>>, %arg5: memref<2x16x128xf32, #tpu.memory_space<vmem>>) attributes {dimension_semantics = [#tpu.dimension_semantics<parallel>, #tpu.dimension_semantics<parallel>], iteration_bounds = array<i64: 1, 1>, scalar_prefetch = 0 : i64, scratch_operands = 0 : i64, tpu.core_type = #tpu.core_type<tc>, window_params = [{transform_indices = @transform_0, window_bounds = array<i64: 2, 8, 128>}, {transform_indices = @transform_1, window_bounds = array<i64: 2, 32, 128>}, {transform_indices = @transform_2, window_bounds = array<i64: 2, 8, 128>}, {transform_indices = @transform_3, window_bounds = array<i64: 2, 16, 128>}]} {
    %c0 = arith.constant 0 : index
    %c0_0 = arith.constant 0 : index
    %c0_1 = arith.constant 0 : index
    %0 = vector.load %arg4[%c0, %c0_0, %c0_1] : memref<2x8x128xf32, #tpu.memory_space<vmem>>, vector<1x8x128xf32>
    %1 = vector.shape_cast %0 : vector<1x8x128xf32> to vector<8x128xf32>
    %c1 = arith.constant 1 : index
    %c0_2 = arith.constant 0 : index
    %c0_3 = arith.constant 0 : index
    %2 = vector.load %arg4[%c1, %c0_2, %c0_3] : memref<2x8x128xf32, #tpu.memory_space<vmem>>, vector<1x8x128xf32>
    %3 = vector.shape_cast %2 : vector<1x8x128xf32> to vector<8x128xf32>
    %c0_4 = arith.constant 0 : index
    %c0_5 = arith.constant 0 : index
    %c0_6 = arith.constant 0 : index
    %4 = vector.load %arg2[%c0_4, %c0_5, %c0_6] : memref<2x8x128xf32, #tpu.memory_space<vmem>>, vector<1x1x128xf32>
    %5 = vector.shape_cast %4 : vector<1x1x128xf32> to vector<1x128xf32>
    %c1_7 = arith.constant 1 : index
    %c0_8 = arith.constant 0 : index
    %c0_9 = arith.constant 0 : index
    %6 = vector.load %arg2[%c1_7, %c0_8, %c0_9] : memref<2x8x128xf32, #tpu.memory_space<vmem>>, vector<1x1x128xf32>
    %7 = vector.shape_cast %6 : vector<1x1x128xf32> to vector<1x128xf32>
    %c0_10 = arith.constant 0 : index
    %c0_11 = arith.constant 0 : index
    %c0_12 = arith.constant 0 : index
    %8 = vector.load %arg3[%c0_10, %c0_11, %c0_12] : memref<2x32x128xf32, #tpu.memory_space<vmem>>, vector<1x8x128xf32>
    %9 = vector.shape_cast %8 : vector<1x8x128xf32> to vector<8x128xf32>
    %c1_13 = arith.constant 1 : index
    %c0_14 = arith.constant 0 : index
    %c0_15 = arith.constant 0 : index
    %10 = vector.load %arg3[%c1_13, %c0_14, %c0_15] : memref<2x32x128xf32, #tpu.memory_space<vmem>>, vector<1x8x128xf32>
    %11 = vector.shape_cast %10 : vector<1x8x128xf32> to vector<8x128xf32>
    %12 = vector.broadcast %5 : vector<1x128xf32> to vector<8x128xf32>
    %13 = arith.mulf %12, %9 : vector<8x128xf32>
    %14 = arith.addf %1, %13 : vector<8x128xf32>
    %15 = vector.broadcast %7 : vector<1x128xf32> to vector<8x128xf32>
    %16 = arith.mulf %15, %11 : vector<8x128xf32>
    %17 = arith.subf %14, %16 : vector<8x128xf32>
    %18 = vector.broadcast %5 : vector<1x128xf32> to vector<8x128xf32>
    %19 = arith.mulf %18, %11 : vector<8x128xf32>
    %20 = arith.addf %3, %19 : vector<8x128xf32>
    %21 = vector.broadcast %7 : vector<1x128xf32> to vector<8x128xf32>
    %22 = arith.mulf %21, %9 : vector<8x128xf32>
    %23 = arith.addf %20, %22 : vector<8x128xf32>
    %c0_16 = arith.constant 0 : index
    %c1_17 = arith.constant 1 : index
    %c0_18 = arith.constant 0 : index
    %24 = vector.load %arg2[%c0_16, %c1_17, %c0_18] : memref<2x8x128xf32, #tpu.memory_space<vmem>>, vector<1x1x128xf32>
    %25 = vector.shape_cast %24 : vector<1x1x128xf32> to vector<1x128xf32>
    %c1_19 = arith.constant 1 : index
    %c1_20 = arith.constant 1 : index
    %c0_21 = arith.constant 0 : index
    %26 = vector.load %arg2[%c1_19, %c1_20, %c0_21] : memref<2x8x128xf32, #tpu.memory_space<vmem>>, vector<1x1x128xf32>
    %27 = vector.shape_cast %26 : vector<1x1x128xf32> to vector<1x128xf32>
    %c0_22 = arith.constant 0 : index
    %c8 = arith.constant 8 : index
    %c0_23 = arith.constant 0 : index
    %28 = vector.load %arg3[%c0_22, %c8, %c0_23] : memref<2x32x128xf32, #tpu.memory_space<vmem>>, vector<1x8x128xf32>
    %29 = vector.shape_cast %28 : vector<1x8x128xf32> to vector<8x128xf32>
    %c1_24 = arith.constant 1 : index
    %c8_25 = arith.constant 8 : index
    %c0_26 = arith.constant 0 : index
    %30 = vector.load %arg3[%c1_24, %c8_25, %c0_26] : memref<2x32x128xf32, #tpu.memory_space<vmem>>, vector<1x8x128xf32>
    %31 = vector.shape_cast %30 : vector<1x8x128xf32> to vector<8x128xf32>
    %32 = vector.broadcast %25 : vector<1x128xf32> to vector<8x128xf32>
    %33 = arith.mulf %32, %29 : vector<8x128xf32>
    %34 = arith.addf %17, %33 : vector<8x128xf32>
    %35 = vector.broadcast %27 : vector<1x128xf32> to vector<8x128xf32>
    %36 = arith.mulf %35, %31 : vector<8x128xf32>
    %37 = arith.subf %34, %36 : vector<8x128xf32>
    %38 = vector.broadcast %25 : vector<1x128xf32> to vector<8x128xf32>
    %39 = arith.mulf %38, %31 : vector<8x128xf32>
    %40 = arith.addf %23, %39 : vector<8x128xf32>
    %41 = vector.broadcast %27 : vector<1x128xf32> to vector<8x128xf32>
    %42 = arith.mulf %41, %29 : vector<8x128xf32>
    %43 = arith.addf %40, %42 : vector<8x128xf32>
    %c0_27 = arith.constant 0 : index
    %c2 = arith.constant 2 : index
    %c0_28 = arith.constant 0 : index
    %44 = vector.load %arg2[%c0_27, %c2, %c0_28] : memref<2x8x128xf32, #tpu.memory_space<vmem>>, vector<1x1x128xf32>
    %45 = vector.shape_cast %44 : vector<1x1x128xf32> to vector<1x128xf32>
    %c1_29 = arith.constant 1 : index
    %c2_30 = arith.constant 2 : index
    %c0_31 = arith.constant 0 : index
    %46 = vector.load %arg2[%c1_29, %c2_30, %c0_31] : memref<2x8x128xf32, #tpu.memory_space<vmem>>, vector<1x1x128xf32>
    %47 = vector.shape_cast %46 : vector<1x1x128xf32> to vector<1x128xf32>
    %c0_32 = arith.constant 0 : index
    %c16 = arith.constant 16 : index
    %c0_33 = arith.constant 0 : index
    %48 = vector.load %arg3[%c0_32, %c16, %c0_33] : memref<2x32x128xf32, #tpu.memory_space<vmem>>, vector<1x8x128xf32>
    %49 = vector.shape_cast %48 : vector<1x8x128xf32> to vector<8x128xf32>
    %c1_34 = arith.constant 1 : index
    %c16_35 = arith.constant 16 : index
    %c0_36 = arith.constant 0 : index
    %50 = vector.load %arg3[%c1_34, %c16_35, %c0_36] : memref<2x32x128xf32, #tpu.memory_space<vmem>>, vector<1x8x128xf32>
    %51 = vector.shape_cast %50 : vector<1x8x128xf32> to vector<8x128xf32>
    %52 = vector.broadcast %45 : vector<1x128xf32> to vector<8x128xf32>
    %53 = arith.mulf %52, %49 : vector<8x128xf32>
    %54 = arith.addf %37, %53 : vector<8x128xf32>
    %55 = vector.broadcast %47 : vector<1x128xf32> to vector<8x128xf32>
    %56 = arith.mulf %55, %51 : vector<8x128xf32>
    %57 = arith.subf %54, %56 : vector<8x128xf32>
    %58 = vector.broadcast %45 : vector<1x128xf32> to vector<8x128xf32>
    %59 = arith.mulf %58, %51 : vector<8x128xf32>
    %60 = arith.addf %43, %59 : vector<8x128xf32>
    %61 = vector.broadcast %47 : vector<1x128xf32> to vector<8x128xf32>
    %62 = arith.mulf %61, %49 : vector<8x128xf32>
    %63 = arith.addf %60, %62 : vector<8x128xf32>
    %c0_37 = arith.constant 0 : index
    %c3 = arith.constant 3 : index
    %c0_38 = arith.constant 0 : index
    %64 = vector.load %arg2[%c0_37, %c3, %c0_38] : memref<2x8x128xf32, #tpu.memory_space<vmem>>, vector<1x1x128xf32>
    %65 = vector.shape_cast %64 : vector<1x1x128xf32> to vector<1x128xf32>
    %c1_39 = arith.constant 1 : index
    %c3_40 = arith.constant 3 : index
    %c0_41 = arith.constant 0 : index
    %66 = vector.load %arg2[%c1_39, %c3_40, %c0_41] : memref<2x8x128xf32, #tpu.memory_space<vmem>>, vector<1x1x128xf32>
    %67 = vector.shape_cast %66 : vector<1x1x128xf32> to vector<1x128xf32>
    %c0_42 = arith.constant 0 : index
    %c24 = arith.constant 24 : index
    %c0_43 = arith.constant 0 : index
    %68 = vector.load %arg3[%c0_42, %c24, %c0_43] : memref<2x32x128xf32, #tpu.memory_space<vmem>>, vector<1x8x128xf32>
    %69 = vector.shape_cast %68 : vector<1x8x128xf32> to vector<8x128xf32>
    %c1_44 = arith.constant 1 : index
    %c24_45 = arith.constant 24 : index
    %c0_46 = arith.constant 0 : index
    %70 = vector.load %arg3[%c1_44, %c24_45, %c0_46] : memref<2x32x128xf32, #tpu.memory_space<vmem>>, vector<1x8x128xf32>
    %71 = vector.shape_cast %70 : vector<1x8x128xf32> to vector<8x128xf32>
    %72 = vector.broadcast %65 : vector<1x128xf32> to vector<8x128xf32>
    %73 = arith.mulf %72, %69 : vector<8x128xf32>
    %74 = arith.addf %57, %73 : vector<8x128xf32>
    %75 = vector.broadcast %67 : vector<1x128xf32> to vector<8x128xf32>
    %76 = arith.mulf %75, %71 : vector<8x128xf32>
    %77 = arith.subf %74, %76 : vector<8x128xf32>
    %78 = vector.broadcast %65 : vector<1x128xf32> to vector<8x128xf32>
    %79 = arith.mulf %78, %71 : vector<8x128xf32>
    %80 = arith.addf %63, %79 : vector<8x128xf32>
    %81 = vector.broadcast %67 : vector<1x128xf32> to vector<8x128xf32>
    %82 = arith.mulf %81, %69 : vector<8x128xf32>
    %83 = arith.addf %80, %82 : vector<8x128xf32>
    %c0_47 = arith.constant 0 : index
    %c0_48 = arith.constant 0 : index
    %c0_49 = arith.constant 0 : index
    %84 = vector.load %arg5[%c0_47, %c0_48, %c0_49] : memref<2x16x128xf32, #tpu.memory_space<vmem>>, vector<1x8x128xf32>
    %85 = vector.shape_cast %84 : vector<1x8x128xf32> to vector<8x128xf32>
    %86 = vector.shape_cast %77 : vector<8x128xf32> to vector<1x8x128xf32>
    tpu.vector_store %arg5[%c0_47, %c0_48, %c0_49], %86 {strides = array<i32>} : memref<2x16x128xf32, #tpu.memory_space<vmem>>, vector<1x8x128xf32>,
    %c1_50 = arith.constant 1 : index
    %c0_51 = arith.constant 0 : index
    %c0_52 = arith.constant 0 : index
    %87 = vector.load %arg5[%c1_50, %c0_51, %c0_52] : memref<2x16x128xf32, #tpu.memory_space<vmem>>, vector<1x8x128xf32>
    %88 = vector.shape_cast %87 : vector<1x8x128xf32> to vector<8x128xf32>
    %89 = vector.shape_cast %83 : vector<8x128xf32> to vector<1x8x128xf32>
    tpu.vector_store %arg5[%c1_50, %c0_51, %c0_52], %89 {strides = array<i32>} : memref<2x16x128xf32, #tpu.memory_space<vmem>>, vector<1x8x128xf32>,
    %c0_53 = arith.constant 0 : index
    %c4 = arith.constant 4 : index
    %c0_54 = arith.constant 0 : index
    %90 = vector.load %arg2[%c0_53, %c4, %c0_54] : memref<2x8x128xf32, #tpu.memory_space<vmem>>, vector<1x1x128xf32>
    %91 = vector.shape_cast %90 : vector<1x1x128xf32> to vector<1x128xf32>
    %c1_55 = arith.constant 1 : index
    %c4_56 = arith.constant 4 : index
    %c0_57 = arith.constant 0 : index
    %92 = vector.load %arg2[%c1_55, %c4_56, %c0_57] : memref<2x8x128xf32, #tpu.memory_space<vmem>>, vector<1x1x128xf32>
    %93 = vector.shape_cast %92 : vector<1x1x128xf32> to vector<1x128xf32>
    %c0_58 = arith.constant 0 : index
    %c0_59 = arith.constant 0 : index
    %c0_60 = arith.constant 0 : index
    %94 = vector.load %arg3[%c0_58, %c0_59, %c0_60] : memref<2x32x128xf32, #tpu.memory_space<vmem>>, vector<1x8x128xf32>
    %95 = vector.shape_cast %94 : vector<1x8x128xf32> to vector<8x128xf32>
    %c1_61 = arith.constant 1 : index
    %c0_62 = arith.constant 0 : index
    %c0_63 = arith.constant 0 : index
    %96 = vector.load %arg3[%c1_61, %c0_62, %c0_63] : memref<2x32x128xf32, #tpu.memory_space<vmem>>, vector<1x8x128xf32>
    %97 = vector.shape_cast %96 : vector<1x8x128xf32> to vector<8x128xf32>
    %98 = vector.broadcast %91 : vector<1x128xf32> to vector<8x128xf32>
    %99 = arith.mulf %98, %95 : vector<8x128xf32>
    %100 = arith.addf %1, %99 : vector<8x128xf32>
    %101 = vector.broadcast %93 : vector<1x128xf32> to vector<8x128xf32>
    %102 = arith.mulf %101, %97 : vector<8x128xf32>
    %103 = arith.subf %100, %102 : vector<8x128xf32>
    %104 = vector.broadcast %91 : vector<1x128xf32> to vector<8x128xf32>
    %105 = arith.mulf %104, %97 : vector<8x128xf32>
    %106 = arith.addf %3, %105 : vector<8x128xf32>
    %107 = vector.broadcast %93 : vector<1x128xf32> to vector<8x128xf32>
    %108 = arith.mulf %107, %95 : vector<8x128xf32>
    %109 = arith.addf %106, %108 : vector<8x128xf32>
    %c0_64 = arith.constant 0 : index
    %c5 = arith.constant 5 : index
    %c0_65 = arith.constant 0 : index
    %110 = vector.load %arg2[%c0_64, %c5, %c0_65] : memref<2x8x128xf32, #tpu.memory_space<vmem>>, vector<1x1x128xf32>
    %111 = vector.shape_cast %110 : vector<1x1x128xf32> to vector<1x128xf32>
    %c1_66 = arith.constant 1 : index
    %c5_67 = arith.constant 5 : index
    %c0_68 = arith.constant 0 : index
    %112 = vector.load %arg2[%c1_66, %c5_67, %c0_68] : memref<2x8x128xf32, #tpu.memory_space<vmem>>, vector<1x1x128xf32>
    %113 = vector.shape_cast %112 : vector<1x1x128xf32> to vector<1x128xf32>
    %c0_69 = arith.constant 0 : index
    %c8_70 = arith.constant 8 : index
    %c0_71 = arith.constant 0 : index
    %114 = vector.load %arg3[%c0_69, %c8_70, %c0_71] : memref<2x32x128xf32, #tpu.memory_space<vmem>>, vector<1x8x128xf32>
    %115 = vector.shape_cast %114 : vector<1x8x128xf32> to vector<8x128xf32>
    %c1_72 = arith.constant 1 : index
    %c8_73 = arith.constant 8 : index
    %c0_74 = arith.constant 0 : index
    %116 = vector.load %arg3[%c1_72, %c8_73, %c0_74] : memref<2x32x128xf32, #tpu.memory_space<vmem>>, vector<1x8x128xf32>
    %117 = vector.shape_cast %116 : vector<1x8x128xf32> to vector<8x128xf32>
    %118 = vector.broadcast %111 : vector<1x128xf32> to vector<8x128xf32>
    %119 = arith.mulf %118, %115 : vector<8x128xf32>
    %120 = arith.addf %103, %119 : vector<8x128xf32>
    %121 = vector.broadcast %113 : vector<1x128xf32> to vector<8x128xf32>
    %122 = arith.mulf %121, %117 : vector<8x128xf32>
    %123 = arith.subf %120, %122 : vector<8x128xf32>
    %124 = vector.broadcast %111 : vector<1x128xf32> to vector<8x128xf32>
    %125 = arith.mulf %124, %117 : vector<8x128xf32>
    %126 = arith.addf %109, %125 : vector<8x128xf32>
    %127 = vector.broadcast %113 : vector<1x128xf32> to vector<8x128xf32>
    %128 = arith.mulf %127, %115 : vector<8x128xf32>
    %129 = arith.addf %126, %128 : vector<8x128xf32>
    %c0_75 = arith.constant 0 : index
    %c6 = arith.constant 6 : index
    %c0_76 = arith.constant 0 : index
    %130 = vector.load %arg2[%c0_75, %c6, %c0_76] : memref<2x8x128xf32, #tpu.memory_space<vmem>>, vector<1x1x128xf32>
    %131 = vector.shape_cast %130 : vector<1x1x128xf32> to vector<1x128xf32>
    %c1_77 = arith.constant 1 : index
    %c6_78 = arith.constant 6 : index
    %c0_79 = arith.constant 0 : index
    %132 = vector.load %arg2[%c1_77, %c6_78, %c0_79] : memref<2x8x128xf32, #tpu.memory_space<vmem>>, vector<1x1x128xf32>
    %133 = vector.shape_cast %132 : vector<1x1x128xf32> to vector<1x128xf32>
    %c0_80 = arith.constant 0 : index
    %c16_81 = arith.constant 16 : index
    %c0_82 = arith.constant 0 : index
    %134 = vector.load %arg3[%c0_80, %c16_81, %c0_82] : memref<2x32x128xf32, #tpu.memory_space<vmem>>, vector<1x8x128xf32>
    %135 = vector.shape_cast %134 : vector<1x8x128xf32> to vector<8x128xf32>
    %c1_83 = arith.constant 1 : index
    %c16_84 = arith.constant 16 : index
    %c0_85 = arith.constant 0 : index
    %136 = vector.load %arg3[%c1_83, %c16_84, %c0_85] : memref<2x32x128xf32, #tpu.memory_space<vmem>>, vector<1x8x128xf32>
    %137 = vector.shape_cast %136 : vector<1x8x128xf32> to vector<8x128xf32>
    %138 = vector.broadcast %131 : vector<1x128xf32> to vector<8x128xf32>
    %139 = arith.mulf %138, %135 : vector<8x128xf32>
    %140 = arith.addf %123, %139 : vector<8x128xf32>
    %141 = vector.broadcast %133 : vector<1x128xf32> to vector<8x128xf32>
    %142 = arith.mulf %141, %137 : vector<8x128xf32>
    %143 = arith.subf %140, %142 : vector<8x128xf32>
    %144 = vector.broadcast %131 : vector<1x128xf32> to vector<8x128xf32>
    %145 = arith.mulf %144, %137 : vector<8x128xf32>
    %146 = arith.addf %129, %145 : vector<8x128xf32>
    %147 = vector.broadcast %133 : vector<1x128xf32> to vector<8x128xf32>
    %148 = arith.mulf %147, %135 : vector<8x128xf32>
    %149 = arith.addf %146, %148 : vector<8x128xf32>
    %c0_86 = arith.constant 0 : index
    %c7 = arith.constant 7 : index
    %c0_87 = arith.constant 0 : index
    %150 = vector.load %arg2[%c0_86, %c7, %c0_87] : memref<2x8x128xf32, #tpu.memory_space<vmem>>, vector<1x1x128xf32>
    %151 = vector.shape_cast %150 : vector<1x1x128xf32> to vector<1x128xf32>
    %c1_88 = arith.constant 1 : index
    %c7_89 = arith.constant 7 : index
    %c0_90 = arith.constant 0 : index
    %152 = vector.load %arg2[%c1_88, %c7_89, %c0_90] : memref<2x8x128xf32, #tpu.memory_space<vmem>>, vector<1x1x128xf32>
    %153 = vector.shape_cast %152 : vector<1x1x128xf32> to vector<1x128xf32>
    %c0_91 = arith.constant 0 : index
    %c24_92 = arith.constant 24 : index
    %c0_93 = arith.constant 0 : index
    %154 = vector.load %arg3[%c0_91, %c24_92, %c0_93] : memref<2x32x128xf32, #tpu.memory_space<vmem>>, vector<1x8x128xf32>
    %155 = vector.shape_cast %154 : vector<1x8x128xf32> to vector<8x128xf32>
    %c1_94 = arith.constant 1 : index
    %c24_95 = arith.constant 24 : index
    %c0_96 = arith.constant 0 : index
    %156 = vector.load %arg3[%c1_94, %c24_95, %c0_96] : memref<2x32x128xf32, #tpu.memory_space<vmem>>, vector<1x8x128xf32>
    %157 = vector.shape_cast %156 : vector<1x8x128xf32> to vector<8x128xf32>
    %158 = vector.broadcast %151 : vector<1x128xf32> to vector<8x128xf32>
    %159 = arith.mulf %158, %155 : vector<8x128xf32>
    %160 = arith.addf %143, %159 : vector<8x128xf32>
    %161 = vector.broadcast %153 : vector<1x128xf32> to vector<8x128xf32>
    %162 = arith.mulf %161, %157 : vector<8x128xf32>
    %163 = arith.subf %160, %162 : vector<8x128xf32>
    %164 = vector.broadcast %151 : vector<1x128xf32> to vector<8x128xf32>
    %165 = arith.mulf %164, %157 : vector<8x128xf32>
    %166 = arith.addf %149, %165 : vector<8x128xf32>
    %167 = vector.broadcast %153 : vector<1x128xf32> to vector<8x128xf32>
    %168 = arith.mulf %167, %155 : vector<8x128xf32>
    %169 = arith.addf %166, %168 : vector<8x128xf32>
    %c0_97 = arith.constant 0 : index
    %c8_98 = arith.constant 8 : index
    %c0_99 = arith.constant 0 : index
    %170 = vector.load %arg5[%c0_97, %c8_98, %c0_99] : memref<2x16x128xf32, #tpu.memory_space<vmem>>, vector<1x8x128xf32>
    %171 = vector.shape_cast %170 : vector<1x8x128xf32> to vector<8x128xf32>
    %172 = vector.shape_cast %163 : vector<8x128xf32> to vector<1x8x128xf32>
    tpu.vector_store %arg5[%c0_97, %c8_98, %c0_99], %172 {strides = array<i32>} : memref<2x16x128xf32, #tpu.memory_space<vmem>>, vector<1x8x128xf32>,
    %c1_100 = arith.constant 1 : index
    %c8_101 = arith.constant 8 : index
    %c0_102 = arith.constant 0 : index
    %173 = vector.load %arg5[%c1_100, %c8_101, %c0_102] : memref<2x16x128xf32, #tpu.memory_space<vmem>>, vector<1x8x128xf32>
    %174 = vector.shape_cast %173 : vector<1x8x128xf32> to vector<8x128xf32>
    %175 = vector.shape_cast %169 : vector<8x128xf32> to vector<1x8x128xf32>
    tpu.vector_store %arg5[%c1_100, %c8_101, %c0_102], %175 {strides = array<i32>} : memref<2x16x128xf32, #tpu.memory_space<vmem>>, vector<1x8x128xf32>,
    return
  }
  func.func @transform_0(%arg0: i32, %arg1: i32) -> (i32, i32, i32) {
    %c0_i32 = arith.constant 0 : i32
    %c0_i32_0 = arith.constant 0 : i32
    return %c0_i32, %arg0, %arg1 : i32, i32, i32
  }
  func.func @transform_1(%arg0: i32, %arg1: i32) -> (i32, i32, i32) {
    %c0_i32 = arith.constant 0 : i32
    %c0_i32_0 = arith.constant 0 : i32
    %c0_i32_1 = arith.constant 0 : i32
    return %c0_i32, %c0_i32_0, %arg1 : i32, i32, i32
  }
  func.func @transform_2(%arg0: i32, %arg1: i32) -> (i32, i32, i32) {
    %c0_i32 = arith.constant 0 : i32
    %c0_i32_0 = arith.constant 0 : i32
    %c0_i32_1 = arith.constant 0 : i32
    return %c0_i32, %c0_i32_0, %arg1 : i32, i32, i32
  }
  func.func @transform_3(%arg0: i32, %arg1: i32) -> (i32, i32, i32) {
    %c0_i32 = arith.constant 0 : i32
    %c0_i32_0 = arith.constant 0 : i32
    return %c0_i32, %arg0, %arg1 : i32, i32, i32
  }
}

</mosaic_0001>

<bundles_post_ra>
// kernel: tpu_custom_call.1
= control target key start
LH: loop header
LB: loop body
LE: loop exit
PB: predicated region body
PF: predicated region fallthrough
CT: control target
= control target key end

     0   :  { %8 = vsyncpa [#allocation3], 0  ;;  %s384_s0 = inlined_call_operand.hbm [shape: f32[2,8,128], index: 0, kind: input, shape index: {}]   ;;  %s385_s1 = inlined_call_operand.hbm [shape: f32[2,32,128], index: 1, kind: input, shape index: {}]   ;;  %s386_s2 = inlined_call_operand.hbm [shape: f32[2,8,128], index: 2, kind: input, shape index: {}]   ;;  %s387_s3 = inlined_call_operand.hbm [shape: f32[2,16,128], index: 3, kind: output, shape index: {}]  }
   0x1   :  { %9 = vsyncpa [#allocation6], 0 }
   0x2   :  { %10 = vsyncpa [#allocation4], 0  ;;  %s28_s14 = sshll.u32 %s385_s1, 4  ;;  %s328_s15 = smov [#allocation5]   ;;  %s29_s14 = int_to_ptr.hbm [resolvable:$true] %s28_s14 }
   0x3   :  { %s30_s16 = sshll.u32 %s328_s15, 4  ;;  %s15_s19 = sshll.u32 %s384_s0, 4  ;;  %s31_s16 = int_to_ptr.vmem [resolvable:$true] %s30_s16  ;;  %s16_s19 = int_to_ptr.hbm [resolvable:$true] %s15_s19 }
   0x4   :  { %s329_s20 = smov 128   ;;  %s330_s21 = smov 8  }
   0x5   :  { %36 = dma.hbm_to_vmem [thread:$0]  %s29_s14, 1024, %s31_s16, [#allocation6], %s329_s20, %s329_s20, %s330_s21  }
   0x6   :  { %s331_s22 = smov [#allocation2]   ;;  %s41_s1 = sshll.u32 %s386_s2, 4  ;;  %s42_s1 = int_to_ptr.hbm [resolvable:$true] %s41_s1 }
   0x7   :  { %s17_s23 = sshll.u32 %s331_s22, 4  ;;  %s332_s0 = smov [#allocation7]   ;;  %s18_s23 = int_to_ptr.vmem [resolvable:$true] %s17_s23 }
   0x8   :  { %23 = dma.hbm_to_vmem [thread:$0]  %s16_s19, 256, %s18_s23, [#allocation3], %s329_s20, %s329_s20, %s330_s21  }
   0x9   :  { %s43_s26 = sshll.u32 %s332_s0, 4  ;;  %s44_s26 = int_to_ptr.vmem [resolvable:$true] %s43_s26 }
   0xa   :  { %49 = dma.hbm_to_vmem [thread:$0]  %s42_s1, 256, %s44_s26, [#allocation6], %s329_s20, %s329_s20, %s330_s21  }
   0xb   :  { %322 = dma.done.wait [#allocation3], 256  }
   0xc   :  { %323 = vsyncadd [#allocation3], 4294967040 }
   0xd   :  { %324 = dma.done.wait [#allocation6], 1280  }
   0xe   :  { %325 = vsyncadd [#allocation6], 4294966016  ;;  %v62_v0 = vld [vmem:[#allocation7] sm:$0xff]  ;;  %v210_v3 = vld [vmem:[#allocation2] ss:$0 sm:$0xff]  ;;  %s333_s2 = smov [#allocation8]  }
   0xf   :  { %v68_v1 = vld [vmem:[#allocation5] sm:$0xff]  ;;  %v211_v4 = vld [vmem:[#allocation2 + $0x8] ss:$0 sm:$0xff]  ;;  %v83_v6 = vld [vmem:[#allocation5 + $0x8] sm:$0xff]  ;;  %s188_s27 = sshll.u32 %s333_s2, 4  ;;  %s190_s30 = sshll.u32 %s387_s3, 4  ;;  %s189_s27 = int_to_ptr.vmem [resolvable:$true] %s188_s27  ;;  %s191_s30 = int_to_ptr.hbm [resolvable:$true] %s190_s30 }
  0x10   :  { %v70_v2 = vld [vmem:[#allocation5 + $0x20] sm:$0xff]  ;;  %v72_v5 = vmul.f32 %v210_v3, %v68_v1  ;;  %v212_v7 = vld [vmem:[#allocation2 + $0x1] ss:$0 sm:$0xff]  ;;  %v213_v9 = vld [vmem:[#allocation2 + $0x9] ss:$0 sm:$0xff]  ;;  %v79_v22 = vmul.f32 %v211_v4, %v68_v1 }
  0x11   :  { %v75_v8 = vmul.f32 %v211_v4, %v70_v2  ;;  %v84_v11 = vld [vmem:[#allocation5 + $0x28] sm:$0xff]  ;;  %v86_v12 = vmul.f32 %v212_v7, %v83_v6  ;;  %v97_v13 = vld [vmem:[#allocation5 + $0x10] sm:$0xff]  ;;  %v77_v15 = vmul.f32 %v210_v3, %v70_v2  ;;  %v215_v16 = vld [vmem:[#allocation2 + $0xa] ss:$0 sm:$0xff]  ;;  %v93_v32 = vmul.f32 %v213_v9, %v83_v6 }
  0x12   :  { %v73_v10 = vadd.f32 %v72_v5, %v62_v0  ;;  %v214_v14 = vld [vmem:[#allocation2 + $0x2] ss:$0 sm:$0xff]  ;;  %v89_v18 = vmul.f32 %v213_v9, %v84_v11  ;;  %v372_v20 = vld [vmem:[#allocation5 + $0x18] sm:$0xff]  ;;  %v216_v21 = vld [vmem:[#allocation2 + $0x3] ss:$0 sm:$0xff]  ;;  %v91_v28 = vmul.f32 %v212_v7, %v84_v11  ;;  %v107_v50 = vmul.f32 %v215_v16, %v97_v13 }
  0x13   :  { %v98_v19 = vld [vmem:[#allocation5 + $0x30] sm:$0xff]  ;;  %v217_v23 = vld [vmem:[#allocation2 + $0xb] ss:$0 sm:$0xff]  ;;  %v64_v24 = vld [vmem:[#allocation7 + $0x8] sm:$0xff]  ;;  %v100_v26 = vmul.f32 %v214_v14, %v97_v13  ;;  %v114_v39 = vmul.f32 %v216_v21, %v372_v20 }
  0x14   :  { %v76_v17 = vsub.f32 %v73_v10, %v75_v8  ;;  %v78_v27 = vadd.f32 %v77_v15, %v64_v24  ;;  %v218_v29 = vld [vmem:[#allocation2 + $0x4] ss:$0 sm:$0xff]  ;;  %v219_v30 = vld [vmem:[#allocation2 + $0xc] ss:$0 sm:$0xff]  ;;  %v103_v31 = vmul.f32 %v215_v16, %v98_v19  ;;  %v220_v33 = vld [vmem:[#allocation2 + $0x5] ss:$0 sm:$0xff]  ;;  %v105_v40 = vmul.f32 %v214_v14, %v98_v19 }
  0x15   :  { %v131_v36 = vmul.f32 %v218_v29, %v68_v1  ;;  %v134_v37 = vmul.f32 %v219_v30, %v70_v2  ;;  %v221_v38 = vld [vmem:[#allocation2 + $0xd] ss:$0 sm:$0xff]  ;;  %v136_v41 = vmul.f32 %v218_v29, %v70_v2  ;;  %v138_v42 = vmul.f32 %v219_v30, %v68_v1  ;;  %v222_v48 = vld [vmem:[#allocation2 + $0x6] ss:$0 sm:$0xff]  ;;  %v223_v57 = vld [vmem:[#allocation2 + $0xe] ss:$0 sm:$0xff] }
  0x16   :  { %v87_v25 = vadd.f32 %v86_v12, %v76_v17  ;;  %v80_v35 = vadd.f32 %v79_v22, %v78_v27  ;;  %v112_v44 = vld [vmem:[#allocation5 + $0x38] sm:$0xff]  ;;  %v145_v47 = vmul.f32 %v220_v33, %v83_v6  ;;  %v150_v52 = vmul.f32 %v220_v33, %v84_v11  ;;  %v224_v2 = vld [vmem:[#allocation2 + $0x7] ss:$0 sm:$0xff] }
  0x17   :  { %v132_v46 = vadd.f32 %v131_v36, %v62_v0  ;;  %v117_v49 = vmul.f32 %v217_v23, %v112_v44  ;;  %v137_v51 = vadd.f32 %v136_v41, %v64_v24  ;;  %v148_v56 = vmul.f32 %v221_v38, %v84_v11  ;;  %v225_v10 = vld [vmem:[#allocation2 + $0xf] ss:$0 sm:$0xff] }
  0x18   :  { %v90_v34 = vsub.f32 %v87_v25, %v89_v18  ;;  %v92_v45 = vadd.f32 %v91_v28, %v80_v35  ;;  %v119_v58 = vmul.f32 %v216_v21, %v112_v44  ;;  %v152_v60 = vmul.f32 %v221_v38, %v83_v6 }
  0x19   :  { %v135_v55 = vsub.f32 %v132_v46, %v134_v37  ;;  %v139_v59 = vadd.f32 %v138_v42, %v137_v51  ;;  %v159_v1 = vmul.f32 %v222_v48, %v97_v13  ;;  %v121_v0 = vmul.f32 %v217_v23, %v372_v20 }
  0x1a   :  { %v101_v43 = vadd.f32 %v100_v26, %v90_v34  ;;  %v94_v54 = vadd.f32 %v93_v32, %v92_v45  ;;  %v164_v4 = vmul.f32 %v222_v48, %v98_v19  ;;  %v162_v9 = vmul.f32 %v223_v57, %v98_v19 }
  0x1b   :  { %v146_v63 = vadd.f32 %v145_v47, %v135_v55  ;;  %v151_v3 = vadd.f32 %v150_v52, %v139_v59  ;;  %v166_v11 = vmul.f32 %v223_v57, %v97_v13  ;;  %v173_v6 = vmul.f32 %v224_v2, %v372_v20 }
  0x1c   :  { %v104_v53 = vsub.f32 %v101_v43, %v103_v31  ;;  %v106_v62 = vadd.f32 %v105_v40, %v94_v54  ;;  %v178_v17 = vmul.f32 %v224_v2, %v112_v44  ;;  %v176_v22 = vmul.f32 %v225_v10, %v112_v44 }
  0x1d   :  { %v149_v8 = vsub.f32 %v146_v63, %v148_v56  ;;  %v153_v12 = vadd.f32 %v152_v60, %v151_v3  ;;  %v180_v24 = vmul.f32 %v225_v10, %v372_v20 }
  0x1e   :  { %v115_v61 = vadd.f32 %v114_v39, %v104_v53  ;;  %v108_v7 = vadd.f32 %v107_v50, %v106_v62 }
  0x1f   :  { %v160_v15 = vadd.f32 %v159_v1, %v149_v8  ;;  %v165_v16 = vadd.f32 %v164_v4, %v153_v12 }
  0x20   :  { %v118_v5 = vsub.f32 %v115_v61, %v117_v49  ;;  %v120_v14 = vadd.f32 %v119_v58, %v108_v7 }
  0x21   :  { %v163_v21 = vsub.f32 %v160_v15, %v162_v9  ;;  %v167_v23 = vadd.f32 %v166_v11, %v165_v16 }
  0x22   :  { %123 = vst [vmem:[#allocation8] sm:$0xff] %v118_v5  ;;  %v122_v18 = vadd.f32 %v121_v0, %v120_v14 }
  0x23   :  { %v174_v25 = vadd.f32 %v173_v6, %v163_v21  ;;  %v179_v13 = vadd.f32 %v178_v17, %v167_v23 }
  0x24   :  { %125 = vst [vmem:[#allocation8 + $0x10] sm:$0xff] %v122_v18 }
  0x25   :  { %v177_v19 = vsub.f32 %v174_v25, %v176_v22  ;;  %v181_v26 = vadd.f32 %v180_v24, %v179_v13 }
  0x27   :  { %182 = vst [vmem:[#allocation8 + $0x8] sm:$0xff] %v177_v19 }
  0x28   :  { %183 = vst [vmem:[#allocation8 + $0x18] sm:$0xff] %v181_v26 }
  0x29   :  { %196 = dma.vmem_to_hbm [thread:$0]  %s189_s27, 512, %s191_s30, [#allocation4], %s329_s20, %s329_s20, %s330_s21  }
  0x2a   :  { %326 = dma.done.wait [#allocation4], 512  }
  0x2b   :  { %327 = vsyncadd [#allocation4], 4294966784 }
  0x2c   :  { %201 = vsyncpa [#allocation3], 1 }
  0x2d   :  { %202 = vsyncpa [#allocation6], 1 }
  0x2e   :  { %203 = vsyncpa [#allocation4], 1 }

</bundles_post_ra>
